<compile_context>
chip_gen: v5e
topology: v5e:2x2
jax: 0.10.0
libtpu: 0.0.40
codegen_flags: <defaults>
</compile_context>

<pallas_src>
import functools

import jax
import jax.numpy as jnp
from jax import lax
from jax.experimental import pallas as pl
from jax.experimental.pallas import tpu as pltpu


def _attn_kernel(w_ref, ctx_ref, tgt_ref, out_ref, attn_ref, *, approx_recip):
    # w_ref   : (idf, cdf)        f32   (grid-invariant)
    # ctx_ref : (cdf, sourceL)    f32   (constant across the queryL-tile axis)
    # tgt_ref : (idf, TQ)         matmul dtype (bf16 on the fast path)
    # out_ref : (idf, TQ)         weightedContext tile
    # attn_ref: (sourceL, TQ)     attention tile (already in "transposed" layout)

    # sourceT = conv1x1(context) == W @ context -> (idf, sourceL). Tiny; keep f32.
    src = jnp.dot(w_ref[...], ctx_ref[...], preferred_element_type=jnp.float32)

    tgt = tgt_ref[...]                      # (idf, TQ)
    src_lp = src.astype(tgt.dtype)

    # scores directly in (sourceL, queryL) layout: contract over idf (axis 0 of both).
    # Avoids two XLU transposes and keeps queryL on the lane axis.
    scores = lax.dot_general(
        src_lp, tgt,
        dimension_numbers=(((0,), (0,)), ((), ())),
        preferred_element_type=jnp.float32)          # (sourceL, TQ), f32

    # softmax over sourceL (axis 0), computed in f32, lane-dense over queryL.
    m = jnp.max(scores, axis=0, keepdims=True)
    e = jnp.exp(scores - m)
    denom = jnp.sum(e, axis=0, keepdims=True)
    if approx_recip:
        probs = e * pl.reciprocal(denom, approx=True)   # divide goes to EUP slot
    else:
        probs = e / denom
    # attn written from f32 probs (no transpose needed, lane-dense store).
    attn_ref[...] = probs.astype(attn_ref.dtype)

    # weightedContext = sourceT @ attn -> (idf, TQ); low-precision operands on the
    # fast path, f32 accumulation on the MXU.
    wc = jnp.dot(src_lp, probs.astype(src_lp.dtype),
                 preferred_element_type=jnp.float32)
    out_ref[...] = wc.astype(out_ref.dtype)


def _pick_tq(queryL, max_tq):
    """Largest multiple-of-128 divisor of queryL that is <= max_tq (else full queryL)."""
    if queryL <= max_tq or queryL % 128 != 0:
        return queryL
    tq = (max_tq // 128) * 128
    while queryL % tq != 0:
        tq -= 128
    return tq


def global_attention_general(inp, context, conv_weight, *,
                             matmul_dtype=jnp.bfloat16,
                             max_tq=1024,
                             approx_recip=True):
    """
    inp         : (B, idf, ih, iw)   float32
    context     : (B, cdf, sourceL)  float32
    conv_weight : (idf, cdf)         float32  (1x1 conv weight, squeezed)

    returns (weightedContext (B, idf, ih, iw), attn (B, sourceL, ih, iw))
    """
    B, idf, ih, iw = inp.shape
    _, cdf, sourceL = context.shape
    queryL = ih * iw
    out_dtype = inp.dtype

    TQ = _pick_tq(queryL, max_tq)
    num_q = queryL // TQ

    # Pre-cast the dominant input to the matmul dtype (halves its DMA bytes on the
    # bf16 fast path). Weight/context stay f32 (tiny; keeps the 1x1 conv accurate).
    target = inp.reshape(B, idf, queryL).astype(matmul_dtype)
    context = context.astype(jnp.float32)
    conv_weight = conv_weight.astype(jnp.float32)

    kernel = functools.partial(_attn_kernel, approx_recip=approx_recip)

    out_wc, out_attn = pl.pallas_call(
        kernel,
        out_shape=(
            jax.ShapeDtypeStruct((B, idf, queryL), out_dtype),
            jax.ShapeDtypeStruct((B, sourceL, queryL), out_dtype),
        ),
        grid_spec=pltpu.PrefetchScalarGridSpec(
            num_scalar_prefetch=0,
            grid=(B, num_q),
            in_specs=[
                pl.BlockSpec((idf, cdf), lambda b, q: (0, 0)),               # weight
                pl.BlockSpec((None, cdf, sourceL), lambda b, q: (b, 0, 0)),  # context
                pl.BlockSpec((None, idf, TQ), lambda b, q: (b, 0, q)),       # target
            ],
            out_specs=[
                pl.BlockSpec((None, idf, TQ), lambda b, q: (b, 0, q)),       # weightedContext
                pl.BlockSpec((None, sourceL, TQ), lambda b, q: (b, 0, q)),   # attn
            ],
        ),
        compiler_params=pltpu.CompilerParams(
            dimension_semantics=("parallel", "parallel")),
    )(conv_weight, context, target)

    weighted = out_wc.reshape(B, idf, ih, iw)
    attn = out_attn.reshape(B, sourceL, ih, iw)
    return weighted, attn


def _reference(inp, context, conv_weight):
    B, idf, ih, iw = inp.shape
    _, cdf, sourceL = context.shape
    queryL = ih * iw
    target = inp.reshape(B, idf, queryL)
    sourceT = jnp.einsum("oc,bcs->bos", conv_weight, context)   # (B, idf, sourceL)
    attn = jnp.einsum("biq,bis->bqs", target, sourceT)          # (B, queryL, sourceL)
    attn = jax.nn.softmax(attn, axis=-1)
    attnT = jnp.transpose(attn, (0, 2, 1))                      # (B, sourceL, queryL)
    wc = jnp.einsum("bis,bsq->biq", sourceT, attnT)             # (B, idf, queryL)
    return wc.reshape(B, idf, ih, iw), attnT.reshape(B, sourceL, ih, iw)


if __name__ == "__main__":
    key = jax.random.PRNGKey(0)
    k1, k2, k3, k4, k5, k6 = jax.random.split(key, 6)

    # --- Config 1: small shapes, single queryL tile, exact (f32) path, tight check.
    B, idf, cdf = 2, 32, 16
    ih = iw = 4          # queryL = 16
    sourceL = 8
    inp = jax.random.normal(k1, (B, idf, ih, iw), dtype=jnp.float32)
    context = jax.random.normal(k2, (B, cdf, sourceL), dtype=jnp.float32)
    conv_weight = (jax.random.normal(k3, (idf, cdf), dtype=jnp.float32)
                   * (1.0 / jnp.sqrt(cdf)))

    wc, attn = global_attention_general(
        inp, context, conv_weight,
        matmul_dtype=jnp.float32, approx_recip=False)
    jax.block_until_ready((wc, attn))
    wc_ref, attn_ref = _reference(inp, context, conv_weight)
    assert jnp.allclose(wc, wc_ref, atol=1e-4, rtol=1e-4)
    assert jnp.allclose(attn, attn_ref, atol=1e-5, rtol=1e-5)

    # --- Config 2: multiple queryL tiles (queryL=256, TQ=128) on the fast path
    #     (bf16 matmul operands, f32 accumulate, approx-reciprocal softmax).
    B2, idf2, cdf2 = 2, 48, 24
    ih2 = iw2 = 16       # queryL = 256 -> two 128-wide tiles
    sourceL2 = 16
    inp2 = jax.random.normal(k4, (B2, idf2, ih2, iw2), dtype=jnp.float32)
    context2 = jax.random.normal(k5, (B2, cdf2, sourceL2), dtype=jnp.float32)
    conv_weight2 = (jax.random.normal(k6, (idf2, cdf2), dtype=jnp.float32)
                    * (1.0 / jnp.sqrt(cdf2)))

    wc2, attn2 = global_attention_general(
        inp2, context2, conv_weight2,
        matmul_dtype=jnp.bfloat16, max_tq=128, approx_recip=True)
    jax.block_until_ready((wc2, attn2))
    wc2_ref, attn2_ref = _reference(inp2, context2, conv_weight2)
    # bf16 matmul operands + approx reciprocal -> looser tolerance.
    assert jnp.allclose(wc2, wc2_ref, atol=1e-1, rtol=1e-1)
    assert jnp.allclose(attn2, attn2_ref, atol=5e-2, rtol=5e-2)
    # attention is a softmax over sourceL: columns must sum to ~1.
    assert jnp.allclose(jnp.sum(attn2, axis=1), 1.0, atol=5e-3)

    print("KERNEL_OK")
</pallas_src>

<mosaic_0001>
module attributes {stable_mosaic.version = 11 : i64} {
  func.func @_attn_kernel(%arg0: i32, %arg1: i32, %arg2: memref<32x16xf32, #tpu.memory_space<vmem>>, %arg3: memref<1x16x8xf32, #tpu.memory_space<vmem>>, %arg4: memref<1x32x16xf32, #tpu.memory_space<vmem>>, %arg5: memref<1x32x16xf32, #tpu.memory_space<vmem>>, %arg6: memref<1x8x16xf32, #tpu.memory_space<vmem>>) attributes {dimension_semantics = [#tpu.dimension_semantics<parallel>, #tpu.dimension_semantics<parallel>], iteration_bounds = array<i64: 2, 1>, scalar_prefetch = 0 : i64, scratch_operands = 0 : i64, tpu.core_type = #tpu.core_type<tc>, window_params = [{pipeline_mode = #tpu.pipeline_mode<synchronous>, transform_indices = @transform_0, window_bounds = array<i64: 32, 16>}, {transform_indices = @transform_1, window_bounds = array<i64: 1, 16, 8>}, {transform_indices = @transform_2, window_bounds = array<i64: 1, 32, 16>}, {transform_indices = @transform_3, window_bounds = array<i64: 1, 32, 16>}, {transform_indices = @transform_4, window_bounds = array<i64: 1, 8, 16>}]} {
    %c0 = arith.constant 0 : index
    %c0_0 = arith.constant 0 : index
    %0 = vector.load %arg2[%c0, %c0_0] : memref<32x16xf32, #tpu.memory_space<vmem>>, vector<32x16xf32>
    %c0_1 = arith.constant 0 : index
    %c0_2 = arith.constant 0 : index
    %c0_3 = arith.constant 0 : index
    %1 = vector.load %arg3[%c0_1, %c0_2, %c0_3] : memref<1x16x8xf32, #tpu.memory_space<vmem>>, vector<1x16x8xf32>
    %2 = vector.shape_cast %1 : vector<1x16x8xf32> to vector<16x8xf32>
    %cst = arith.constant dense<0.000000e+00> : vector<32x8xf32>
    %3 = tpu.matmul %0, %2, %cst {dimension_numbers = #tpu.dot_dimension_numbers<[1], [0], [0], [1], [0, 0, 1, 1], [], []>} : vector<32x16xf32>, vector<16x8xf32>, vector<32x8xf32> -> vector<32x8xf32>
    %c0_4 = arith.constant 0 : index
    %c0_5 = arith.constant 0 : index
    %c0_6 = arith.constant 0 : index
    %4 = vector.load %arg4[%c0_4, %c0_5, %c0_6] : memref<1x32x16xf32, #tpu.memory_space<vmem>>, vector<1x32x16xf32>
    %5 = vector.shape_cast %4 : vector<1x32x16xf32> to vector<32x16xf32>
    %cst_7 = arith.constant dense<0.000000e+00> : vector<8x16xf32>
    %6 = tpu.matmul %3, %5, %cst_7 {dimension_numbers = #tpu.dot_dimension_numbers<[0], [0], [1], [1], [0, 1, 1, 1], [], []>} : vector<32x8xf32>, vector<32x16xf32>, vector<8x16xf32> -> vector<8x16xf32>
    %cst_8 = arith.constant dense<0xFF800000> : vector<16xf32>
    %7 = vector.multi_reduction <maximumf>, %6, %cst_8 [0] : vector<8x16xf32> to vector<16xf32>
    %8 = vector.shape_cast %7 : vector<16xf32> to vector<1x16xf32>
    %9 = vector.broadcast %8 : vector<1x16xf32> to vector<8x16xf32>
    %10 = arith.subf %6, %9 : vector<8x16xf32>
    %11 = math.exp %10 : vector<8x16xf32>
    %cst_9 = arith.constant dense<0.000000e+00> : vector<16xf32>
    %12 = vector.multi_reduction <add>, %11, %cst_9 [0] : vector<8x16xf32> to vector<16xf32>
    %13 = vector.shape_cast %12 : vector<16xf32> to vector<1x16xf32>
    %14 = vector.broadcast %13 : vector<1x16xf32> to vector<8x16xf32>
    %15 = arith.divf %11, %14 : vector<8x16xf32>
    %c0_10 = arith.constant 0 : index
    %c0_11 = arith.constant 0 : index
    %c0_12 = arith.constant 0 : index
    %16 = vector.load %arg6[%c0_10, %c0_11, %c0_12] : memref<1x8x16xf32, #tpu.memory_space<vmem>>, vector<1x8x16xf32>
    %17 = vector.shape_cast %16 : vector<1x8x16xf32> to vector<8x16xf32>
    %18 = vector.shape_cast %15 : vector<8x16xf32> to vector<1x8x16xf32>
    tpu.vector_store %arg6[%c0_10, %c0_11, %c0_12], %18 {strides = array<i32>} : memref<1x8x16xf32, #tpu.memory_space<vmem>>, vector<1x8x16xf32>,
    %cst_13 = arith.constant dense<0.000000e+00> : vector<32x16xf32>
    %19 = tpu.matmul %3, %15, %cst_13 {dimension_numbers = #tpu.dot_dimension_numbers<[1], [0], [0], [1], [0, 0, 1, 1], [], []>} : vector<32x8xf32>, vector<8x16xf32>, vector<32x16xf32> -> vector<32x16xf32>
    %c0_14 = arith.constant 0 : index
    %c0_15 = arith.constant 0 : index
    %c0_16 = arith.constant 0 : index
    %20 = vector.load %arg5[%c0_14, %c0_15, %c0_16] : memref<1x32x16xf32, #tpu.memory_space<vmem>>, vector<1x32x16xf32>
    %21 = vector.shape_cast %20 : vector<1x32x16xf32> to vector<32x16xf32>
    %22 = vector.shape_cast %19 : vector<32x16xf32> to vector<1x32x16xf32>
    tpu.vector_store %arg5[%c0_14, %c0_15, %c0_16], %22 {strides = array<i32>} : memref<1x32x16xf32, #tpu.memory_space<vmem>>, vector<1x32x16xf32>,
    return
  }
  func.func @transform_0(%arg0: i32, %arg1: i32) -> (i32, i32) {
    %c0_i32 = arith.constant 0 : i32
    %c0_i32_0 = arith.constant 0 : i32
    %c0_i32_1 = arith.constant 0 : i32
    return %c0_i32, %c0_i32_0 : i32, i32
  }
  func.func @transform_1(%arg0: i32, %arg1: i32) -> (i32, i32, i32) {
    %c0_i32 = arith.constant 0 : i32
    %c0_i32_0 = arith.constant 0 : i32
    %c0_i32_1 = arith.constant 0 : i32
    return %arg0, %c0_i32, %c0_i32_0 : i32, i32, i32
  }
  func.func @transform_2(%arg0: i32, %arg1: i32) -> (i32, i32, i32) {
    %c0_i32 = arith.constant 0 : i32
    %c0_i32_0 = arith.constant 0 : i32
    return %arg0, %c0_i32, %arg1 : i32, i32, i32
  }
  func.func @transform_3(%arg0: i32, %arg1: i32) -> (i32, i32, i32) {
    %c0_i32 = arith.constant 0 : i32
    %c0_i32_0 = arith.constant 0 : i32
    return %arg0, %c0_i32, %arg1 : i32, i32, i32
  }
  func.func @transform_4(%arg0: i32, %arg1: i32) -> (i32, i32, i32) {
    %c0_i32 = arith.constant 0 : i32
    %c0_i32_0 = arith.constant 0 : i32
    return %arg0, %c0_i32, %arg1 : i32, i32, i32
  }
}

</mosaic_0001>

<bundles_post_ra>
// kernel: tpu_custom_call.1
= control target key start
LH: loop header
LB: loop body
LE: loop exit
PB: predicated region body
PF: predicated region fallthrough
CT: control target
= control target key end

     0   :  { %10 = vsyncpa [#allocation3], 0  ;;  %s929_s0 = inlined_call_operand.vmem [shape: f32[32,16], index: 0, kind: input, shape index: {}]   ;;  %s930_s1 = inlined_call_operand.vmem [shape: f32[2,16,8], index: 1, kind: input, shape index: {}]   ;;  %s931_s2 = inlined_call_operand.vmem [shape: f32[2,32,16], index: 2, kind: input, shape index: {}]   ;;  %s932_s3 = inlined_call_operand.vmem [shape: f32[2,32,16], index: 3, kind: output, shape index: {0}]   ;;  %s933_s4 = inlined_call_operand.hbm [shape: f32[2,8,16], index: 4, kind: output, shape index: {1}]  }
   0x1   :  { %12 = vsyncpa [#allocation3 + $0x1], 0  ;;  %s795_s15 = smov 0   ;;  %s797_s16 = smov 0  }
   0x2   :  { %s799_s17 = smov 0   ;;  %s801_s18 = smov 0  }
   0x3   :  { %s803_s19 = smov 0   ;;  %s805_s20 = smov 0  }
   0x4 LB: > { %s599_s21 = sadd.s32 4294967295, %s768_s20   ;;  %s600_s22 = sadd.s32 4294967294, %s768_s20   ;;  %s768_s20 = sphi %s805_s20, %s18_s20   ;;  %s764_s19 = sphi %s803_s19, %s942_s19   ;;  %s760_s18 = sphi %s801_s18, %s941_s18   ;;  %s756_s17 = sphi %s799_s17, %s940_s17   ;;  %s752_s16 = sphi %s797_s16, %s939_s16   ;;  %s748_s15 = sphi %s795_s15, %s938_s15  }
   0x5   : > { %s30_s23 = sadd.s32 1, %s764_s19  ;;  %s142_s24 = sadd.s32 1, %s756_s17 }
   0x6   : > { %p32_p0 = scmp.ge.s32.totalorder %s30_s23, 2  ;;  %p152_p1 = scmp.ne.s32.totalorder %s756_s17, %s752_s16 }
   0x7   : > { %p153_p2 = scmp.eq.s32.totalorder %s599_s21, 1  ;;  %p158_p3 = scmp.ne.s32.totalorder %s752_s16, %s748_s15 }
   0x8   : > { %s944_s23 = smov (%p32_p0, %s30_s23), 0  ;;  %p159_p5 = scmp.eq.s32.totalorder %s600_s22, 1 }
   0x9   : > { %p835_p4 = por %p153_p2, %p152_p1  ;;  %s137_s26 = ssub.s32 %s764_s19, %s944_s23 }
   0xa   : > { %p603_p6 = scmp.ge.s32.totalorder %s768_s20, 1  ;;  %p140_p7 = scmp.eq.s32.totalorder %s137_s26, 0 }
   0xb   : > { %p842_p8 = por %p159_p5, %p158_p3  ;;  %p199_p9 = scmp.lt.s32.totalorder %s768_s20, 3 }
   0xc   : > { %s848_s28 = scalar_select %p140_p7, %s756_s17, %s142_s24  }
   0xd   : > { %p200_p10 = pnand %p603_p6, %p199_p9 }
   0xe   : > { %p241_p11 = scmp.lt.s32.totalorder (!%p200_p10), %s760_s18, 1  ;;  %s238_s5 = sand.u32 (!%p200_p10), 1, %s752_s16  }
   0xf   : > { %203 = sbr.rel (%p200_p10) target bundleno = 651 (0x28b), region = 32  ;;  %s604_s6 = sshll.u32 (!%p200_p10), %s238_s5, 3 }
  0x10   : > { %s621_s8 = sshll.u32 (!%p200_p10), %s760_s18, 3  ;;  %s458_s14 = scalar_lea.sflag (!%p200_p10), [#allocation3], %s238_s5 }
  0x11   : > { %s472_s11 = scalar_lea.hbm (!%p200_p10), %s933_s4, %s621_s8 }
  0x12   : > { %s476_s13 = sshll.u32 (!%p200_p10), %s472_s11, 4  ;;  %s477_s13 = int_to_ptr.hbm [resolvable:$true] %s476_s13 }
  0x13   : > { %s704_s21 = sshra.s32 (!%p200_p10), %s477_s13, 4  ;;  %s705_s21 = int_to_ptr.hbm [resolvable:$true] %s704_s21 }
  0x14   : > { %s852_s29 = scalar_select %p241_p11, %s760_s18, 1  ;;  %v262_v2 = vld [vmem:[%s929_s0] sm:$0xff]  ;;  %vm268_vm0 = vcmask 130048   ;;  %v263_v3 = vld [vmem:[%s929_s0 + $0x8] sm:$0xff]  ;;  %v264_v4 = vld [vmem:[%s929_s0 + $0x10] sm:$0xff]  ;;  %vm346_vm1 = vcmask 261120  }
  0x15   : > { %v265_v5 = vld [vmem:[%s929_s0 + $0x18] sm:$0xff]  ;;  %vm403_vm6 = vcmask 64512   ;;  %s706_s24 = scalar_lea.hbm %s705_s21, 8  ;;  %s710_s18 = scalar_lea.hbm %s933_s4, 16 }
  0x16   : > { %s624_s30 = sshll.u32 %s852_s29, 4  ;;  %s934_s22 = sshll.u32 %s852_s29, 5 }
  0x17   : > { %s245_s7 = scalar_lea.vmem %s930_s1, %s624_s30  ;;  %s253_s30 = scalar_lea.vmem %s931_s2, %s934_s22 }
  0x18   : > { %v267_v0 = vld [vmem:[%s245_s7 + $0x8] sm:$0xff]  ;;  %v266_v1 = vld [vmem:[%s245_s7] sm:$0xff]  ;;  %v313_v6 = vld [vmem:[%s253_s30 + $0x18] sm:$0xff]  ;;  %s240_s7 = scalar_lea.vmem [#allocation2], %s604_s6  ;;  %p707_p12 = scmp.ne.s32.totalorder %s705_s21, %s706_s24 }
  0x19   : > { %295 = vmatpush.msra.mxu0 %v267_v0  ;;  %627 = vmatpush.msra.mxu3 %v267_v0  ;;  %v312_v7 = vld [vmem:[%s253_s30 + $0x10] sm:$0xff]  ;;  %v311_v8 = vld [vmem:[%s253_s30 + $0x8] sm:$0xff]  ;;  %v310_v9 = vld [vmem:[%s253_s30] sm:$0xff]  ;;  %s474_s12 = sshll.u32 %s240_s7, 4  ;;  %p711_p1 = scmp.lt.s32.totalorder %s705_s21, %s933_s4  ;;  %s475_s12 = int_to_ptr.vmem [resolvable:$true] %s474_s12 }
  0x1a   : > { %362 = vmatpush.msra.mxu1 %v313_v6  ;;  %p708_p13 = pnand %p707_p12, %p835_p4  ;;  %p712_p2 = scmp.lt.s32.totalorder %s710_s18, %s706_s24 }
  0x1b   : > { %296 = vmatpush.msra.mxu0 %v266_v1  ;;  %628 = vmatpush.msra.mxu3 %v266_v1 }
  0x1c   : > { %611 = vmatmul.msk.f32.vlgmr.msra.gmra.mxu0 %vm268_vm0, %v262_v2  ;;  %612 = vmatmul.msk.f32.vlgmr.msra.gmra.mxu3 %vm268_vm0, %v263_v3  ;;  %p709_p0 = pneg %p708_p13  ;;  %p713_p3 = por %p712_p2, %p711_p1 }
  0x1d   : > { %363 = vmatpush.msra.mxu1 %v312_v7 }
  0x1e   : > { %p714_p5 = pnand %p713_p3, %p709_p0 }
  0x1f   : > { %364 = vmatpush.msra.mxu1 %v311_v8 }
  0x21   : > { %365 = vmatpush.msra.mxu1 %v310_v9 }
  0x24   : > { %613 = vmatmul.msk.f32.gmra.mxu3 %vm268_vm0, %v264_v4 }
  0x2c   : > { %614 = vmatmul.msk.f32.gmra.mxu3 %vm268_vm0, %v265_v5 }
  0x99   : > { %v298_v10 = vpop.f32.mrf.mxu0 }
  0x9a   : > { %314 = vxpose.xlu0.b32.start [1/4] (short) (narrow) %v298_v10, 8 }
  0x9f   : > { %v301_v11 = vpop.f32.mrf.mxu3 }
  0xa2   : > { %315 = vxpose.xlu0.b32.cont [2/4] (short) (narrow) %v301_v11, 8 }
  0xa7   : > { %v304_v12 = vpop.f32.mrf.mxu3 }
  0xaa   : > { %316 = vxpose.xlu0.b32.cont [3/4] (short) (narrow) %v304_v12, 8 }
  0xaf   : > { %v307_v13 = vpop.f32.mrf.mxu3 }
  0xb2   : > { %317 = vxpose.xlu0.b32.end [4/4] (short) (narrow) %v307_v13, 8 }
 0x13e   : > { %v330_v14 = vpop.trf.xlu0 }
 0x13f   : > { %615 = vmatmul.msk.f32.vlgmr.msra.gmra.mxu1 %vm346_vm1, %v330_v14 }
 0x1bc   : > { %v367_v15 = vpop.f32.mrf.mxu1 }
 0x1bd   : > { %v370_v16 = vsel %vm268_vm0, %v367_v15, -inf }
 0x1be   : > { %v371_v17 = vrot.slane %v370_v16, 4 }
 0x1c0   : > { %v372_v18 = vmax.f32 %v370_v16, %v371_v17 }
 0x1c2   : > { %v373_v19 = vrot.slane %v372_v18, 2 }
 0x1c4   : > { %v374_v20 = vmax.f32 %v372_v18, %v373_v19 }
 0x1c6   : > { %v375_v21 = vrot.slane %v374_v20, 1 }
 0x1c8   : > { %v376_v22 = vmax.f32 %v374_v20, %v375_v21 }
 0x1ca   : > { %v377_v23 = vsub.f32 %v367_v15, %v376_v22 }
 0x1cc   : > { %v378_v24 = vmul.f32 1.442695, %v377_v23 }
 0x1ce   : > { %686 = vpow2.f32 %v378_v24 }
 0x1d4   : > { %v687_v25 = vpop.eup %686 }
 0x1d5   : > { %v380_v26 = vsel %vm268_vm0, %v687_v25, 0.0 }
 0x1d6   : > { %v381_v27 = vrot.slane %v380_v26, 4 }
 0x1d8   : > { %v382_v28 = vadd.f32 %v381_v27, %v380_v26 }
 0x1da   : > { %v383_v29 = vrot.slane %v382_v28, 2 }
 0x1dc   : > { %v384_v30 = vadd.f32 %v383_v29, %v382_v28 }
 0x1de   : > { %v385_v31 = vrot.slane %v384_v30, 1 }
 0x1e0   : > { %v386_v32 = vadd.f32 %v385_v31, %v384_v30 }
 0x1e2   : > { %688 = vrcp.f32 %v386_v32  ;;  %v398_v36 = vand.u32 2147483648, %v386_v32  ;;  %v396_v38 = vand.u32 2147483647, %v386_v32  ;;  %vm392_vm3 = vweird.f32 %v386_v32 }
 0x1e4   : > { %v399_v40 = vor.u32 1.1754944e-38, %v398_v36  ;;  %vm397_vm5 = vcmp.eq.f32.partialorder %v396_v38, 8.507059e+37 }
 0x1e8   : > { %v689_v33 = vpop.eup %688 }
 0x1e9   : > { %v388_v34 = vmul.f32 %v689_v33, %v386_v32  ;;  %vm393_vm2 = vweird.f32 %v689_v33 }
 0x1ea   : > { %vm394_vm4 = vmor %vm392_vm3, %vm393_vm2 }
 0x1eb   : > { %v389_v35 = vsub.f32 1.0, %v388_v34 }
 0x1ed   : > { %v390_v37 = vmul.f32 %v689_v33, %v389_v35 }
 0x1ef   : > { %v391_v39 = vadd.f32 %v689_v33, %v390_v37 }
 0x1f1   : > { %v395_v41 = vsel %vm394_vm4, %v689_v33, %v391_v39 }
 0x1f2   : > { %v400_v42 = vsel %vm397_vm5, %v399_v40, %v395_v41 }
 0x1f3   : > { %v401_v43 = vmul.f32 %v687_v25, %v400_v42 }
 0x1f5   : > { %431 = vmatpush.msrb.mxu0 %v401_v43  ;;  %629 = vmatpush.msra.mxu2 %v401_v43  ;;  %402 = vst.msk [vmem:[%s240_s7] sm:$0xff] %vm268_vm0, %v401_v43 }
 0x1f6   : > { %616 = vmatmul.msk.f32.vlgmr.msrb.gmra.mxu0 %vm403_vm6, %v298_v10  ;;  %617 = vmatmul.msk.f32.vlgmr.msra.gmra.mxu2 %vm403_vm6, %v301_v11 }
 0x1fe   : > { %618 = vmatmul.msk.f32.gmra.mxu2 %vm403_vm6, %v304_v12 }
 0x206   : > { %619 = vmatmul.msk.f32.gmra.mxu2 %vm403_vm6, %v307_v13 }
 0x207   : > { %717 = shalt.err (!%p714_p5)
}
 0x208   : > { %630 = dma.vmem_to_hbm [thread:$0]  (%p835_p4), %s475_s12, 128, %s477_s13, %s458_s14  }
 0x209   : > { %s937_s5 = sshll.u32 %s852_s29, 5 }
 0x20a   : > { %s261_s9 = scalar_lea.vmem %s932_s3, %s937_s5 }
 0x273   : > { %v433_v44 = vpop.f32.mrf.mxu0 }
 0x274   : > { %445 = vst.msk [vmem:[%s261_s9] sm:$0xff] %vm268_vm0, %v433_v44 }
 0x279   : > { %v436_v45 = vpop.f32.mrf.mxu2 }
 0x27a   : > { %446 = vst.msk [vmem:[%s261_s9 + $0x8] sm:$0xff] %vm268_vm0, %v436_v45 }
 0x281   : > { %v439_v46 = vpop.f32.mrf.mxu2 }
 0x282   : > { %447 = vst.msk [vmem:[%s261_s9 + $0x10] sm:$0xff] %vm268_vm0, %v439_v46 }
 0x289   : > { %v442_v47 = vpop.f32.mrf.mxu2 }
 0x28a   : > { %448 = vst.msk [vmem:[%s261_s9 + $0x18] sm:$0xff] %vm268_vm0, %v442_v47 }
 0x28b PF: > { %p636_p4 = scmp.ge.s32.totalorder %s768_s20, 2  ;;  %s499_s25 = sand.u32 1, %s748_s15  }
 0x28c   : > { %s500_s29 = scalar_lea.sflag [#allocation3], %s499_s25 }
 0x28d   : > { %p633_p6 = pnand %p636_p4, %p842_p8 }
 0x28f   : > { %p634_p7 = pneg %p633_p6 }
 0x291   : > { %743 = dma.done.wait (%p634_p7), %s500_s29, 128  }
 0x292   : > { %745 = vsyncadd (%p634_p7), %s500_s29, 4294967168  ;;  %s18_s20 = sadd.s32 1, %s768_s20   ;;  %s938_s15 = smov %s752_s16 }
 0x293   : > { %p15_p9 = scmp.ge.s32.totalorder %s18_s20, 4   ;;  %s939_s16 = smov %s756_s17 }
 0x294   : > { %s940_s17 = smov %s848_s28  ;;  %s941_s18 = smov %s764_s19 }
 0x295   : > { %s942_s19 = smov %s944_s23  ;;  %17 = sbr.rel (!%p15_p9) target bundleno = 4 (0x4), region = 82 }
 0x29a   :  { %506 = vsyncpa [#allocation3], 1 }
 0x29b   :  { %508 = vsyncpa [#allocation3 + $0x1], 1 }

</bundles_post_ra>
